<compile_context>
chip_gen: v6e
topology: v6e:2x2x1
jax: 0.10.0
libtpu: 0.0.40
codegen_flags: <defaults>
</compile_context>

<pallas_src>
import jax
import jax.numpy as jnp
import numpy as np
from jax.experimental import pallas as pl
from jax.experimental.pallas import tpu as pltpu


def attention_kernel(p_ref, w1_ref, b1_ref, w2_ref, b2_ref, o_ref):
    # p_ref : (1, K, St)  bf16 im2col patches (tap-major, cin-minor rows) for one (n, S-tile)
    # w1_ref: (Cout, K)   bf16 folded 3x3x3 conv weights
    # b1_ref: (Cout, 1)   f32
    # w2_ref: (Cout, Cout) bf16 1x1x1 conv weights
    # b2_ref: (Cout, 1)   f32
    # o_ref : (1, Cout, St) f32 — lane-dense (S on lanes), already NCDHW-ordered
    p = p_ref[0]                                                        # (K, St)

    # 3x3x3 conv == single K=27*Cin MXU matmul, f32 accumulation.
    acc = jnp.dot(w1_ref[...], p, preferred_element_type=jnp.float32)   # (Cout, St)

    h = jnp.maximum(acc + b1_ref[...], 0.0)                             # bias + ReLU (f32)

    # 1x1x1 conv: (Cout, Cout) @ (Cout, St) on the MXU, bf16 operands, f32 accumulate.
    y = jnp.dot(w2_ref[...], h.astype(w2_ref.dtype),
                preferred_element_type=jnp.float32)
    y = y + b2_ref[...]

    # Sigmoid on the EUP slot: exp + approximate reciprocal, then the final +1.
    sig = pl.reciprocal(1.0 + jnp.exp(-y), approx=True)
    o_ref[0] = (sig + 1.0).astype(o_ref.dtype)


def _pick_s_tile(S):
    """Largest multiple-of-128 divisor of S (capped), preferring >= 2 tiles per batch
    element so the software pipeline (and both v7x TensorCores) have work."""
    candidates = [t for t in range(128, min(S, 1024) + 1, 128) if S % t == 0]
    if not candidates:
        return S                       # tiny volume: single full-extent block
    tile = candidates[-1]
    if tile == S and len(candidates) > 1:
        tile = candidates[-2]
    return tile


def attention_forward(x, w1, b1, w2, b2):
    """x: (N, Cin, D, H, W) NCDHW.  Weights in PyTorch layout:
       w1: (Cout, Cin, 3, 3, 3), b1: (Cout,), w2: (Cout, Cout, 1, 1, 1), b2: (Cout,)."""
    N, Cin, D, H, W = x.shape
    Cout = w1.shape[0]
    S = D * H * W
    K = 27 * Cin
    st = _pick_s_tile(S)

    # ---- JAX glue: contiguous channels-first im2col, bf16 matmul operands ----
    xp = jnp.pad(x, ((0, 0), (0, 0), (1, 1), (1, 1), (1, 1)))            # zero pad=1
    taps = [xp[:, :, kd:kd + D, kh:kh + H, kw:kw + W].reshape(N, Cin, S)
            for kd in range(3) for kh in range(3) for kw in range(3)]
    patches = jnp.concatenate(taps, axis=1).astype(jnp.bfloat16)          # (N, K, S)

    # Row order of patches is tap-major / cin-minor -> fold w1 identically.
    w1f = jnp.transpose(w1, (0, 2, 3, 4, 1)).reshape(Cout, K).astype(jnp.bfloat16)
    w2f = w2[:, :, 0, 0, 0].astype(jnp.bfloat16)                          # (Cout_out, Cout_in)
    b1r = b1.reshape(Cout, 1).astype(jnp.float32)
    b2r = b2.reshape(Cout, 1).astype(jnp.float32)

    out = pl.pallas_call(
        attention_kernel,
        out_shape=jax.ShapeDtypeStruct((N, Cout, S), x.dtype),
        grid_spec=pltpu.PrefetchScalarGridSpec(
            num_scalar_prefetch=0,
            grid=(N, S // st),
            in_specs=[
                pl.BlockSpec((1, K, st), lambda n, s: (n, 0, s)),
                pl.BlockSpec((Cout, K), lambda n, s: (0, 0)),
                pl.BlockSpec((Cout, 1), lambda n, s: (0, 0)),
                pl.BlockSpec((Cout, Cout), lambda n, s: (0, 0)),
                pl.BlockSpec((Cout, 1), lambda n, s: (0, 0)),
            ],
            out_specs=pl.BlockSpec((1, Cout, st), lambda n, s: (n, 0, s)),
        ),
        compiler_params=pltpu.CompilerParams(
            dimension_semantics=("parallel", "parallel")),
    )(patches, w1f, b1r, w2f, b2r)

    # Output is already channel-first: just reshape back to NCDHW (no transpose).
    return out.reshape(N, Cout, D, H, W)


def attention_ref(x, w1, b1, w2, b2):
    """Pure-JAX f32 reference (lax conv) matching the PyTorch module semantics."""
    dn = jax.lax.conv_dimension_numbers(x.shape, w1.shape, ('NCDHW', 'OIDHW', 'NCDHW'))
    y = jax.lax.conv_general_dilated(x, w1, (1, 1, 1),
                                     ((1, 1), (1, 1), (1, 1)), dimension_numbers=dn)
    y = y + b1.reshape(1, -1, 1, 1, 1)
    y = jnp.maximum(y, 0.0)
    dn2 = jax.lax.conv_dimension_numbers(y.shape, w2.shape, ('NCDHW', 'OIDHW', 'NCDHW'))
    y = jax.lax.conv_general_dilated(y, w2, (1, 1, 1),
                                     ((0, 0), (0, 0), (0, 0)), dimension_numbers=dn2)
    y = y + b2.reshape(1, -1, 1, 1, 1)
    return jax.nn.sigmoid(y) + 1.0


if __name__ == "__main__":
    # Small shapes consistent with the module: batch=2, in_channels=4,
    # out_channels=8, 3-D spatial volume 8x8x8 (S = 512 -> two 256-wide S tiles).
    N, Cin, Cout, D, H, W = 2, 4, 8, 8, 8, 8

    key = jax.random.PRNGKey(0)
    kx, kw1, kb1, kw2, kb2 = jax.random.split(key, 5)

    x = jax.random.normal(kx, (N, Cin, D, H, W), dtype=jnp.float32)
    w1 = 0.2 * jax.random.normal(kw1, (Cout, Cin, 3, 3, 3), dtype=jnp.float32)
    b1 = 0.1 * jax.random.normal(kb1, (Cout,), dtype=jnp.float32)
    w2 = 0.2 * jax.random.normal(kw2, (Cout, Cout, 1, 1, 1), dtype=jnp.float32)
    b2 = 0.1 * jax.random.normal(kb2, (Cout,), dtype=jnp.float32)

    out = attention_forward(x, w1, b1, w2, b2)
    out = jax.block_until_ready(out)

    ref = jax.block_until_ready(attention_ref(x, w1, b1, w2, b2))
    # bf16 matmul operands + approx reciprocal -> loosened tolerance vs. the f32 reference.
    np.testing.assert_allclose(np.asarray(out), np.asarray(ref), rtol=2e-2, atol=2e-2)

    print("KERNEL_OK")
</pallas_src>

<mosaic_0001>
module attributes {stable_mosaic.version = 11 : i64} {
  func.func @attention_kernel(%arg0: i32, %arg1: i32, %arg2: memref<1x108x256xbf16, #tpu.memory_space<vmem>>, %arg3: memref<8x108xbf16, #tpu.memory_space<vmem>>, %arg4: memref<8x1xf32, #tpu.memory_space<vmem>>, %arg5: memref<8x8xbf16, #tpu.memory_space<vmem>>, %arg6: memref<8x1xf32, #tpu.memory_space<vmem>>, %arg7: memref<1x8x256xf32, #tpu.memory_space<vmem>>) attributes {dimension_semantics = [#tpu.dimension_semantics<parallel>, #tpu.dimension_semantics<parallel>], iteration_bounds = array<i64: 2, 2>, scalar_prefetch = 0 : i64, scratch_operands = 0 : i64, tpu.core_type = #tpu.core_type<tc>, window_params = [{transform_indices = @transform_0, window_bounds = array<i64: 1, 108, 256>}, {pipeline_mode = #tpu.pipeline_mode<synchronous>, transform_indices = @transform_1, window_bounds = array<i64: 8, 108>}, {pipeline_mode = #tpu.pipeline_mode<synchronous>, transform_indices = @transform_2, window_bounds = array<i64: 8, 1>}, {pipeline_mode = #tpu.pipeline_mode<synchronous>, transform_indices = @transform_3, window_bounds = array<i64: 8, 8>}, {pipeline_mode = #tpu.pipeline_mode<synchronous>, transform_indices = @transform_4, window_bounds = array<i64: 8, 1>}, {transform_indices = @transform_5, window_bounds = array<i64: 1, 8, 256>}]} {
    %c0 = arith.constant 0 : index
    %c0_0 = arith.constant 0 : index
    %c0_1 = arith.constant 0 : index
    %0 = vector.load %arg2[%c0, %c0_0, %c0_1] : memref<1x108x256xbf16, #tpu.memory_space<vmem>>, vector<1x108x256xbf16>
    %1 = vector.shape_cast %0 : vector<1x108x256xbf16> to vector<108x256xbf16>
    %c0_2 = arith.constant 0 : index
    %c0_3 = arith.constant 0 : index
    %2 = vector.load %arg3[%c0_2, %c0_3] : memref<8x108xbf16, #tpu.memory_space<vmem>>, vector<8x108xbf16>
    %cst = arith.constant dense<0.000000e+00> : vector<8x256xf32>
    %3 = tpu.matmul %2, %1, %cst {dimension_numbers = #tpu.dot_dimension_numbers<[1], [0], [0], [1], [0, 0, 1, 1], [], []>} : vector<8x108xbf16>, vector<108x256xbf16>, vector<8x256xf32> -> vector<8x256xf32>
    %c0_4 = arith.constant 0 : index
    %c0_5 = arith.constant 0 : index
    %4 = vector.load %arg4[%c0_4, %c0_5] : memref<8x1xf32, #tpu.memory_space<vmem>>, vector<8x1xf32>
    %5 = vector.broadcast %4 : vector<8x1xf32> to vector<8x256xf32>
    %6 = arith.addf %3, %5 : vector<8x256xf32>
    %cst_6 = arith.constant 0.000000e+00 : f32
    %7 = vector.broadcast %cst_6 : f32 to vector<8x256xf32>
    %8 = arith.maximumf %6, %7 : vector<8x256xf32>
    %c0_7 = arith.constant 0 : index
    %c0_8 = arith.constant 0 : index
    %9 = vector.load %arg5[%c0_7, %c0_8] : memref<8x8xbf16, #tpu.memory_space<vmem>>, vector<8x8xbf16>
    %10 = arith.truncf %8 : vector<8x256xf32> to vector<8x256xbf16>
    %cst_9 = arith.constant dense<0.000000e+00> : vector<8x256xf32>
    %11 = tpu.matmul %9, %10, %cst_9 {dimension_numbers = #tpu.dot_dimension_numbers<[1], [0], [0], [1], [0, 0, 1, 1], [], []>} : vector<8x8xbf16>, vector<8x256xbf16>, vector<8x256xf32> -> vector<8x256xf32>
    %c0_10 = arith.constant 0 : index
    %c0_11 = arith.constant 0 : index
    %12 = vector.load %arg6[%c0_10, %c0_11] : memref<8x1xf32, #tpu.memory_space<vmem>>, vector<8x1xf32>
    %13 = vector.broadcast %12 : vector<8x1xf32> to vector<8x256xf32>
    %14 = arith.addf %11, %13 : vector<8x256xf32>
    %cst_12 = arith.constant 0.000000e+00 : f32
    %15 = vector.broadcast %cst_12 : f32 to vector<8x256xf32>
    %16 = arith.subf %15, %14 : vector<8x256xf32>
    %17 = math.exp %16 : vector<8x256xf32>
    %cst_13 = arith.constant 1.000000e+00 : f32
    %18 = vector.broadcast %cst_13 : f32 to vector<8x256xf32>
    %19 = arith.addf %18, %17 : vector<8x256xf32>
    %20 = tpu.reciprocal %19 {approx = true} : vector<8x256xf32> -> vector<8x256xf32>
    %cst_14 = arith.constant 1.000000e+00 : f32
    %21 = vector.broadcast %cst_14 : f32 to vector<8x256xf32>
    %22 = arith.addf %20, %21 : vector<8x256xf32>
    %c0_15 = arith.constant 0 : index
    %c0_16 = arith.constant 0 : index
    %c0_17 = arith.constant 0 : index
    %23 = vector.load %arg7[%c0_15, %c0_16, %c0_17] : memref<1x8x256xf32, #tpu.memory_space<vmem>>, vector<1x8x256xf32>
    %24 = vector.shape_cast %23 : vector<1x8x256xf32> to vector<8x256xf32>
    %25 = vector.shape_cast %22 : vector<8x256xf32> to vector<1x8x256xf32>
    tpu.vector_store %arg7[%c0_15, %c0_16, %c0_17], %25 {strides = array<i32>} : memref<1x8x256xf32, #tpu.memory_space<vmem>>, vector<1x8x256xf32>,
    return
  }
  func.func @transform_0(%arg0: i32, %arg1: i32) -> (i32, i32, i32) {
    %c0_i32 = arith.constant 0 : i32
    %c0_i32_0 = arith.constant 0 : i32
    return %arg0, %c0_i32, %arg1 : i32, i32, i32
  }
  func.func @transform_1(%arg0: i32, %arg1: i32) -> (i32, i32) {
    %c0_i32 = arith.constant 0 : i32
    %c0_i32_0 = arith.constant 0 : i32
    %c0_i32_1 = arith.constant 0 : i32
    return %c0_i32, %c0_i32_0 : i32, i32
  }
  func.func @transform_2(%arg0: i32, %arg1: i32) -> (i32, i32) {
    %c0_i32 = arith.constant 0 : i32
    %c0_i32_0 = arith.constant 0 : i32
    %c0_i32_1 = arith.constant 0 : i32
    return %c0_i32, %c0_i32_0 : i32, i32
  }
  func.func @transform_3(%arg0: i32, %arg1: i32) -> (i32, i32) {
    %c0_i32 = arith.constant 0 : i32
    %c0_i32_0 = arith.constant 0 : i32
    %c0_i32_1 = arith.constant 0 : i32
    return %c0_i32, %c0_i32_0 : i32, i32
  }
  func.func @transform_4(%arg0: i32, %arg1: i32) -> (i32, i32) {
    %c0_i32 = arith.constant 0 : i32
    %c0_i32_0 = arith.constant 0 : i32
    %c0_i32_1 = arith.constant 0 : i32
    return %c0_i32, %c0_i32_0 : i32, i32
  }
  func.func @transform_5(%arg0: i32, %arg1: i32) -> (i32, i32, i32) {
    %c0_i32 = arith.constant 0 : i32
    %c0_i32_0 = arith.constant 0 : i32
    return %arg0, %c0_i32, %arg1 : i32, i32, i32
  }
}

</mosaic_0001>

<bundles_post_ra>
// kernel: tpu_custom_call.1
= control target key start
LH: loop header
LB: loop body
LE: loop exit
PB: predicated region body
PF: predicated region fallthrough
CT: control target
= control target key end

     0   :  { %s1060_s0 = inlined_call_operand.vmem [shape: bf16[2,108,512], index: 0, kind: input, shape index: {}]   ;;  %s1061_s1 = inlined_call_operand.vmem [shape: bf16[8,108], index: 1, kind: input, shape index: {}]   ;;  %s1062_s2 = inlined_call_operand.vmem [shape: f32[8,1], index: 2, kind: input, shape index: {}]   ;;  %s1063_s3 = inlined_call_operand.vmem [shape: bf16[8,8], index: 3, kind: input, shape index: {}]   ;;  %s1064_s4 = inlined_call_operand.vmem [shape: f32[8,1], index: 4, kind: input, shape index: {}]   ;;  %s1065_s5 = inlined_call_operand.hbm [shape: f32[2,8,512], index: 5, kind: output, shape index: {}]  }
   0x1   :  { %1066 = sst [smem:[#allocation6_spill]] %s1060_s0 }
   0x2   :  { %10 = vsyncpa [#allocation4], 0 }
   0x3   :  { %12 = vsyncpa [#allocation4 + $0x1], 0  ;;  %s912_s18 = smov 0   ;;  %s914_s19 = smov 0  }
   0x4   :  { %s916_s20 = smov 0   ;;  %s918_s21 = smov 0  }
   0x5   :  { %s920_s22 = smov 0   ;;  %s922_s23 = smov 0  }
   0x6   :  { %s924_s24 = smov 0   ;;  %s926_s25 = smov 0  }
   0x7 LB: > { %s649_s26 = sadd.s32 4294967295, %s878_s25   ;;  %s650_s27 = sadd.s32 4294967294, %s878_s25   ;;  %s878_s25 = sphi %s926_s25, %s18_s25   ;;  %s874_s24 = sphi %s924_s24, %s1077_s24   ;;  %s870_s23 = sphi %s922_s23, %s1076_s23   ;;  %s866_s22 = sphi %s920_s22, %s1075_s22   ;;  %s862_s21 = sphi %s918_s21, %s1074_s21   ;;  %s858_s20 = sphi %s916_s20, %s1073_s20   ;;  %s854_s19 = sphi %s914_s19, %s1072_s19   ;;  %s850_s18 = sphi %s912_s18, %s1071_s18  }
   0x8   : > { %s27_s28 = sadd.s32 1, %s870_s23  ;;  %s30_s29 = sadd.s32 1, %s874_s24 }
   0x9   : > { %p28_p0 = scmp.ge.s32.totalorder %s27_s28, 2  ;;  %p46_p1 = scmp.ne.s32.totalorder %s858_s20, %s854_s19 }
   0xa   : > { %p47_p2 = scmp.eq.s32.totalorder %s878_s25, 0  ;;  %p162_p5 = scmp.eq.s32.totalorder %s649_s26, 3 }
   0xb   : > { %s1079_s28 = smov (%p28_p0, %s27_s28), 0  ;;  %s1081_s29 = smov (!%p28_p0, %s30_s29), %s874_s24 }
   0xc   : > { %s35_s30 = ssub.s32 %s870_s23, %s1079_s28  ;;  %p964_p3 = por %p47_p2, %p46_p1 }
   0xd   : > { %p32_p4 = scmp.ge.s32.totalorder %s1081_s29, 2  ;;  %p167_p6 = scmp.ne.s32.totalorder %s854_s19, %s850_s18 }
   0xe   : > { %p168_p7 = scmp.eq.s32.totalorder %s650_s27, 3  ;;  %p972_p8 = por %p162_p5, %p46_p1 }
   0xf   : > { %s1083_s29 = smov (%p32_p4, %s1081_s29), 0  ;;  %s39_s11 = sadd.s32 1, %s858_s20 }
  0x10   : > { %p976_p9 = por %p168_p7, %p167_p6  ;;  %s34_s9 = ssub.s32 %s874_s24, %s1083_s29 }
  0x11   : > { %s36_s10 = sor.u32 %s35_s30, %s34_s9  ;;  %p652_p11 = scmp.ge.s32.totalorder %s878_s25, 4 }
  0x12   : > { %p37_p10 = scmp.eq.s32.totalorder %s36_s10, 0 }
  0x13   : > { %196 = sbr.rel (%p652_p11) target bundleno = 41 (0x29), region = 32 }
  0x14   : > { %s984_s12 = scalar_select %p37_p10, %s858_s20, %s39_s11  }
  0x18   : > { %199 = sbr.rel (!%p964_p3) target bundleno = 41 (0x29), region = 36  ;;  %s201_s13 = sand.u32 (%p964_p3), 1, %s858_s20  }
  0x19   : > { %s681_s14 = smul.u32 (%p964_p3), 112, %s201_s13  ;;  %s653_s15 = sshll.u32 (%p964_p3), %s870_s23, 1 }
  0x1a   : > { %s682_s16 = smul.u32 (%p964_p3), 56, %s874_s24  ;;  %s1070_s0 = sld [smem:[#allocation6_spill]] (%p964_p3) }
  0x1b   : > { %s203_s10 = scalar_lea.vmem (%p964_p3), [#allocation2], %s681_s14 }
  0x1c   : > { %s206_s17 = sadd.s32 (%p964_p3), %s682_s16, %s653_s15 }
  0x1d   : > { %s654_s26 = sshll.u32 %s206_s17, 2 }
  0x20   : > { %s208_s9 = scalar_lea.vmem %s1070_s0, %s654_s26 }
  0x21   : > { %v263_v0 = vld [vmem:[%s208_s9] sm:$0xff]  ;;  %v265_v1 = vld [vmem:[%s208_s9 + $0x10] sm:$0xff] }
  0x22   : > { %v267_v2 = vld [vmem:[%s208_s9 + $0x20] sm:$0xff]  ;;  %264 = vst [vmem:[%s203_s10] sm:$0xff] %v263_v0  ;;  %266 = vst [vmem:[%s203_s10 + $0x8] sm:$0xff] %v265_v1  ;;  %v269_v3 = vld [vmem:[%s208_s9 + $0x30] sm:$0xff] }
  0x23   : > { %268 = vst [vmem:[%s203_s10 + $0x10] sm:$0xff] %v267_v2  ;;  %v271_v4 = vld [vmem:[%s208_s9 + $0x40] sm:$0xff]  ;;  %v273_v5 = vld [vmem:[%s208_s9 + $0x50] sm:$0xff]  ;;  %270 = vst [vmem:[%s203_s10 + $0x18] sm:$0xff] %v269_v3 }
  0x24   : > { %272 = vst [vmem:[%s203_s10 + $0x20] sm:$0xff] %v271_v4  ;;  %274 = vst [vmem:[%s203_s10 + $0x28] sm:$0xff] %v273_v5  ;;  %v275_v6 = vld [vmem:[%s208_s9 + $0x60] sm:$0xff]  ;;  %v277_v7 = vld [vmem:[%s208_s9 + $0x70] sm:$0xff] }
  0x25   : > { %v279_v8 = vld [vmem:[%s208_s9 + $0x80] sm:$0xff]  ;;  %276 = vst [vmem:[%s203_s10 + $0x30] sm:$0xff] %v275_v6  ;;  %278 = vst [vmem:[%s203_s10 + $0x38] sm:$0xff] %v277_v7  ;;  %v281_v9 = vld [vmem:[%s208_s9 + $0x90] sm:$0xff] }
  0x26   : > { %280 = vst [vmem:[%s203_s10 + $0x40] sm:$0xff] %v279_v8  ;;  %v283_v10 = vld [vmem:[%s208_s9 + $0xa0] sm:$0xff]  ;;  %v285_v11 = vld [vmem:[%s208_s9 + $0xb0] sm:$0xff]  ;;  %282 = vst [vmem:[%s203_s10 + $0x48] sm:$0xff] %v281_v9 }
  0x27   : > { %284 = vst [vmem:[%s203_s10 + $0x50] sm:$0xff] %v283_v10  ;;  %286 = vst [vmem:[%s203_s10 + $0x58] sm:$0xff] %v285_v11  ;;  %v287_v12 = vld [vmem:[%s208_s9 + $0xc0] sm:$0xff]  ;;  %v289_v13 = vld [vmem:[%s208_s9 + $0xd0] sm:$0xff] }
  0x28   : > { %288 = vst [vmem:[%s203_s10 + $0x60] sm:$0xff] %v287_v12  ;;  %290 = vst [vmem:[%s203_s10 + $0x68] sm:$0xff] %v289_v13 }
  0x29 PF: > { %p655_p12 = scmp.ge.s32.totalorder %s878_s25, 1  ;;  %p295_p13 = scmp.lt.s32.totalorder %s878_s25, 5 }
  0x2b   : > { %p296_p0 = pnand %p655_p12, %p295_p13 }
  0x2c   : > { %s998_s6 = sand.u32 (!%p296_p0), 1, %s854_s19   ;;  %s677_s13 = sshll.u32 (!%p296_p0), %s866_s22, 2 }
  0x2d   : > { %299 = sbr.rel (%p296_p0) target bundleno = 532 (0x214), region = 74  ;;  %s656_s10 = sshll.u32 (!%p296_p0), %s998_s6, 4 }
  0x2e   : > { %s683_s11 = smul.u32 (!%p296_p0), 112, %s998_s6  ;;  %s328_s16 = scalar_lea.vmem (!%p296_p0), [#allocation3], %s656_s10 }
  0x2f   : > { %s551_s9 = scalar_lea.sflag (!%p296_p0), [#allocation4], %s998_s6 }
  0x30   : > { %s304_s17 = scalar_lea.vmem (!%p296_p0), [#allocation2], %s683_s11  ;;  %s676_s11 = sshll.u32 (!%p296_p0), %s862_s21, 1 }
  0x31   : > { %s563_s14 = sadd.s32 (!%p296_p0), %s677_s13, %s676_s11  ;;  %s881_s21 = smov (!%p296_p0), [#allocation3]  }
  0x32   : > { %v880_v14 = vmov 0   ;;  %v347_v15 = vld [vmem:[%s1062_s2] sm:$0xff]  ;;  %vm425_vm0 = vcmask 1045504   ;;  %vm421_vm1 = vcmask 883712   ;;  %vm488_vm2 = vcmask 1043456   ;;  %s678_s15 = sshll.u32 %s563_s14, 7 }
  0x33   : > { %464 = vmatprep.mubr.bf16.mxu0 %v880_v14  ;;  %756 = vset.pattern.permute.xlu0 %v880_v14  ;;  %v478_v16 = vld [vmem:[%s1064_s4] sm:$0xff]  ;;  %vm484_vm3 = vcmask 64512   ;;  %s565_s30 = scalar_lea.hbm %s1065_s5, %s678_s15  ;;  %s790_s22 = sshll.u32 %s881_s21, 4  ;;  %s791_s22 = int_to_ptr.vmem [resolvable:$false] %s790_s22 }
  0x34   : > { %350 = vperm.xlu0 %756, %v347_v15   ;;  %527 = vmatprep.mubr.bf16.mxu1 %v880_v14  ;;  %v757_v17 = vld [vmem:[%s304_s17 + $0x64] ss:$8 sps:$4 sm:$0x3f]   ;;  %v759_v18 = vld [vmem:[%s304_s17 + $0x60] ss:$8 sps:$4 sm:$0x3f]  }
  0x35   : > { %671 = vmatprep.subr.msk.bf16.mxu0 %vm425_vm0, %v757_v17  ;;  %v760_v19 = vld [vmem:[%s304_s17 + $0x54] ss:$8 sps:$4 sm:$0xff]   ;;  %v427_v20 = vsel %vm425_vm0, %v759_v18, 0  ;;  %v762_v21 = vld [vmem:[%s304_s17 + $0x50] ss:$8 sps:$4 sm:$0xff]   ;;  %s792_s10 = scalar_lea.vmem %s791_s22, 512 }
  0x36   : > { %435 = vmatpush1.bf16.msra.mxu0 %v427_v20  ;;  %v763_v22 = vld [vmem:[%s304_s17 + $0x44] ss:$8 sps:$4 sm:$0xff]   ;;  %v765_v23 = vld [vmem:[%s304_s17 + $0x40] ss:$8 sps:$4 sm:$0xff]   ;;  %v766_v24 = vld [vmem:[%s304_s17 + $0x34] ss:$8 sps:$4 sm:$0xff]  }
  0x37   : > { %436 = vmatprep.subr.bf16.mxu0 %v760_v19  ;;  %v768_v25 = vld [vmem:[%s304_s17 + $0x30] ss:$8 sps:$4 sm:$0xff]   ;;  %v769_v26 = vld [vmem:[%s304_s17 + $0x24] ss:$8 sps:$4 sm:$0xff]   ;;  %v771_v27 = vld [vmem:[%s304_s17 + $0x20] ss:$8 sps:$4 sm:$0xff]  }
  0x38   : > { %481 = vperm.xlu0 %756, %v478_v16   ;;  %v772_v28 = vld [vmem:[%s304_s17 + $0x14] ss:$8 sps:$4 sm:$0xff]   ;;  %v774_v29 = vld [vmem:[%s304_s17 + $0x10] ss:$8 sps:$4 sm:$0xff]   ;;  %v775_v30 = vld [vmem:[%s304_s17 + $0x4] ss:$8 sps:$4 sm:$0xff]  }
  0x39   : > { %v777_v31 = vld [vmem:[%s304_s17] ss:$8 sps:$4 sm:$0xff]   ;;  %s567_s17 = sshll.u32 %s328_s16, 4  ;;  %s568_s17 = int_to_ptr.vmem [resolvable:$true] %s567_s17 }
  0x3a   : > { %437 = vmatpush1.bf16.msra.mxu0 %v762_v21  ;;  %v346_v32 = vld [vmem:[%s1061_s1] sm:$0xf]  ;;  %s786_s0 = scalar_lea.vmem %s568_s17, 256  ;;  %p793_p4 = scmp.lt.s32.totalorder %s568_s17, %s791_s22 }
  0x3b   : > { %438 = vmatprep.subr.bf16.mxu0 %v763_v22  ;;  %v475_v45 = vld [vmem:[%s1063_s3] sm:$0xf]  ;;  %p787_p1 = scmp.ne.s32.totalorder %s568_s17, %s786_s0  ;;  %p794_p5 = scmp.lt.s32.totalorder %s792_s10, %s786_s0 }
  0x3d   : > { %p788_p2 = pnand %p787_p1, %p972_p8  ;;  %p795_p6 = por %p794_p5, %p793_p4 }
  0x3e   : > { %439 = vmatpush1.bf16.msra.mxu0 %v765_v23 }
  0x3f   : > { %440 = vmatprep.subr.bf16.mxu0 %v766_v24  ;;  %p789_p3 = pneg %p788_p2 }
  0x41   : > { %p796_p7 = pnand %p795_p6, %p789_p3 }
  0x42   : > { %441 = vmatpush1.bf16.msra.mxu0 %v768_v25 }
  0x43   : > { %442 = vmatprep.subr.bf16.mxu0 %v769_v26 }
  0x46   : > { %443 = vmatpush1.bf16.msra.mxu0 %v771_v27 }
  0x47   : > { %444 = vmatprep.subr.bf16.mxu0 %v772_v28 }
  0x4a   : > { %445 = vmatpush1.bf16.msra.mxu0 %v774_v29 }
  0x4b   : > { %446 = vmatprep.subr.bf16.mxu0 %v775_v30 }
  0x4e   : > { %447 = vmatpush1.bf16.msra.mxu0 %v777_v31 }
  0x51   : > { %672 = vmatmul.mubr.msk.bf16.vlgmr.msra.gmra.mxu0 %vm421_vm1, %v346_v32 }
  0xaf   : > { %v351_v33 = vpop.permute.xlu0 %350 }
  0xb3   : > { %v482_v46 = vpop.permute.xlu0 %481 }
 0x111   : > { %v466_v34 = vpop.f32.mrf.mxu0 }
 0x112   : > { %v467_v35 = vadd.f32 %v466_v34, %v351_v33 }
 0x113   : > { %v468_v36 = vpop.f32.mrf.mxu0 }
 0x114   : > { %v473_v37 = vmax.f32 %v467_v35, 0.0  ;;  %v469_v38 = vadd.f32 %v468_v36, %v351_v33 }
 0x115   : > { %v470_v39 = vpop.f32.mrf.mxu0 }
 0x116   : > { %v476_v40 = vpack.c.bf16 %v473_v37, %v473_v37  ;;  %v474_v41 = vmax.f32 %v469_v38, 0.0 }
 0x117   : > { %v471_v42 = vpop.f32.mrf.mxu0 }
 0x118   : > { %v477_v43 = vpack.c.bf16 %v474_v41, %v474_v41  ;;  %v490_v44 = vsel %vm488_vm2, %v476_v40, 0 }
 0x11a   : > { %673 = vmatprep.subr.msk.bf16.mxu1 %vm488_vm2, %v477_v43 }
 0x11b   : > { %510 = vmatpush1.bf16.msra.mxu1 %v490_v44 }
 0x11e   : > { %674 = vmatmul.mubr.msk.bf16.vlgmr.msra.gmra.mxu1 %vm484_vm3, %v475_v45 }
 0x1de   : > { %v529_v47 = vpop.f32.mrf.mxu1 }
 0x1df   : > { %v530_v48 = vadd.f32 %v529_v47, %v482_v46 }
 0x1e0   : > { %v531_v49 = vpop.f32.mrf.mxu1 }
 0x1e1   : > { %v536_v50 = vsub.f32 0.0, %v530_v48  ;;  %v532_v51 = vadd.f32 %v531_v49, %v482_v46 }
 0x1e2   : > { %v533_v52 = vpop.f32.mrf.mxu1 }
 0x1e3   : > { %v538_v53 = vmul.f32 1.442695, %v536_v50  ;;  %v537_v54 = vsub.f32 0.0, %v532_v51 }
 0x1e4   : > { %v534_v55 = vpop.f32.mrf.mxu1 }
 0x1e5   : > { %778 = vpow2.f32 %v538_v53  ;;  %v540_v56 = vmul.f32 1.442695, %v537_v54 }
 0x1e7   : > { %780 = vpow2.f32 %v540_v56 }
 0x1f2   : > { %v779_v57 = vpop.eup %778 }
 0x1f3   : > { %v542_v58 = vadd.f32 1.0, %v779_v57 }
 0x1f4   : > { %v781_v59 = vpop.eup %780 }
 0x1f5   : > { %782 = vrcp.f32 %v542_v58  ;;  %v543_v60 = vadd.f32 1.0, %v781_v59 }
 0x1f7   : > { %784 = vrcp.f32 %v543_v60 }
 0x202   : > { %v783_v61 = vpop.eup %782 }
 0x203   : > { %v546_v62 = vadd.f32 1.0, %v783_v61 }
 0x204   : > { %v785_v63 = vpop.eup %784 }
 0x205   : > { %v547_v0 = vadd.f32 1.0, %v785_v63  ;;  %548 = vst [vmem:[%s328_s16] sm:$0xff] %v546_v62 }
 0x207   : > { %549 = vst [vmem:[%s328_s16 + $0x8] sm:$0xff] %v547_v0 }
 0x208   : > { %799 = shalt.err (!%p796_p7)
}
 0x209   : > { %s800_s11 = scalar_lea.hbm %s565_s30, 256  ;;  %s804_s14 = scalar_lea.hbm %s1065_s5, 1024 }
 0x20a   : > { %p801_p10 = scmp.ne.s32.totalorder %s565_s30, %s800_s11  ;;  %p805_p13 = scmp.lt.s32.totalorder %s565_s30, %s1065_s5 }
 0x20b   : > { %p806_p0 = scmp.lt.s32.totalorder %s804_s14, %s800_s11 }
 0x20c   : > { %p802_p11 = pnand %p801_p10, %p972_p8 }
 0x20d   : > { %p807_p1 = por %p806_p0, %p805_p13 }
 0x20e   : > { %p803_p12 = pneg %p802_p11 }
 0x210   : > { %p808_p2 = pnand %p807_p1, %p803_p12 }
 0x212   : > { %811 = shalt.err (!%p808_p2)
}
 0x213   : > { %684 = dma.vmem_to_hbm [thread:$0]  (%p972_p8), %s568_s17, 256, %s565_s30, %s551_s9  }
 0x214 PF: > { %p690_p3 = scmp.ge.s32.totalorder %s878_s25, 2  ;;  %s579_s0 = sand.u32 1, %s850_s18  }
 0x215   : > { %s580_s26 = scalar_lea.sflag [#allocation4], %s579_s0 }
 0x216   : > { %p687_p4 = pnand %p690_p3, %p976_p9 }
 0x218   : > { %p688_p5 = pneg %p687_p4 }
 0x21a   : > { %845 = dma.done.wait (%p688_p5), %s580_s26, 256  }
 0x21b   : > { %847 = vsyncadd (%p688_p5), %s580_s26, 4294967040  ;;  %s18_s25 = sadd.s32 1, %s878_s25   ;;  %s1071_s18 = smov %s854_s19 }
 0x21c   : > { %p15_p6 = scmp.ge.s32.totalorder %s18_s25, 6   ;;  %s1072_s19 = smov %s858_s20 }
 0x21d   : > { %s1073_s20 = smov %s984_s12  ;;  %s1074_s21 = smov %s870_s23 }
 0x21e   : > { %s1075_s22 = smov %s874_s24  ;;  %s1076_s23 = smov %s1079_s28 }
 0x21f   : > { %s1077_s24 = smov %s1083_s29  ;;  %17 = sbr.rel (!%p15_p6) target bundleno = 7 (0x7), region = 118 }
 0x224   :  { %585 = vsyncpa [#allocation4], 1 }
 0x225   :  { %587 = vsyncpa [#allocation4 + $0x1], 1 }

</bundles_post_ra>
